<compile_context>
chip_gen: v5e
topology: v5e:2x2
jax: 0.10.0
libtpu: 0.0.40
codegen_flags: <defaults>
</compile_context>

<pallas_src>
import functools

import jax
import jax.numpy as jnp
from jax.experimental import pallas as pl
from jax.experimental.pallas import tpu as pltpu


def _ca_layer_kernel(x_ref, w3_ref, cp_ref, rp_ref, lm_ref, out_ref, xlpad_ref, *, W):
    """One image per grid step, channel-major (C, H*W) layout.

    x_ref   : (1, C, HW) f32   original image (also the tensor that gets gated)
    w3_ref  : (C, 9*C)   bf16  BN-folded conv3x3 weights, columns tap-major (t = dy*3+dx)
    cp_ref  : (C, 3+2Cr) f32   [:,0]=folded conv bias+BN shift, [:,1]=PReLU0 alpha,
                               [:,2]=SE conv#2 bias, [:,3:3+Cr]=w1^T, [:,3+Cr:]=w2
    rp_ref  : (2, Cr)    f32   row 0 = SE conv#1 bias, row 1 = PReLU1 alpha
    lm_ref  : (2, HW)    bf16  horizontal-validity masks for the dx=0 / dx=2 taps
    out_ref : (1, C, HW) f32
    xlpad_ref: (C, HW+2W+2) bf16 scratch -- zero-haloed line buffer of the image
    """
    C = x_ref.shape[1]
    HW = x_ref.shape[2]
    Cr = rp_ref.shape[1]
    halo = W + 1

    xv = x_ref[0]                                                  # (C, HW) f32

    # ---- zero-haloed, lane-dense copy of the image (bf16) --------------------------
    # Only the (W+1)-lane borders are zeroed (never overwritten by anything else); the
    # interior is one full-lane slice store.  No full-scratch zero fill.
    xlpad_ref[:, 0:halo] = jnp.zeros((C, halo), jnp.bfloat16)
    xlpad_ref[:, halo + HW:halo + HW + halo] = jnp.zeros((C, halo), jnp.bfloat16)
    xlpad_ref[:, halo:halo + HW] = xv.astype(jnp.bfloat16)

    # ---- 3x3 conv (+ folded bias/BN) as 9 accumulated MXU matmuls ------------------
    # Tap (dy,dx) of output pixel p = h*W+w reads input pixel p + (dy-1)*W + (dx-1):
    # with the zero halo that is a static lane-offset slice of xlpad.  Vertical
    # out-of-range reads land in the halo; horizontal wrap-around is killed by lm.
    conv = jnp.zeros((C, HW), jnp.float32)
    for dy in range(3):
        for dx in range(3):
            t = dy * 3 + dx
            s = halo + (dy - 1) * W + (dx - 1)
            tap = xlpad_ref[:, s:s + HW]                           # (C, HW) bf16
            if dx == 0:
                tap = tap * lm_ref[0:1, :]                         # kill w == 0 column
            elif dx == 2:
                tap = tap * lm_ref[1:2, :]                         # kill w == W-1 column
            conv += jnp.dot(w3_ref[:, t * C:(t + 1) * C], tap,
                            preferred_element_type=jnp.float32)

    acc = conv + cp_ref[:, 0:1]                                    # folded conv bias + BN
    acc = jnp.where(acc >= 0, acc, cp_ref[:, 1:2] * acc)           # PReLU (per channel)

    # ---- AdaptiveAvgPool2d(1): mean over spatial lanes -> (C, 1) -------------------
    pooled = jnp.sum(acc, axis=1, keepdims=True) * (1.0 / HW)

    # ---- squeeze / excite: tiny per-channel math stays on the VPU/XLU --------------
    w1t = cp_ref[:, 3:3 + Cr]                                      # (C, Cr) = w1^T
    w2 = cp_ref[:, 3 + Cr:3 + 2 * Cr]                              # (C, Cr)
    z = jnp.sum(w1t * pooled, axis=0, keepdims=True) + rp_ref[0:1, :]   # (1, Cr)
    z = jnp.where(z >= 0, z, rp_ref[1:2, :] * z)                        # PReLU
    gate = jax.nn.sigmoid(jnp.sum(w2 * z, axis=1, keepdims=True)
                          + cp_ref[:, 2:3])                             # (C, 1)

    # ---- gate the ORIGINAL input (reference: return x * y) -------------------------
    out_ref[0] = xv * gate


def prepare_params(p):
    """Fold conv bias + BatchNorm (inference) into the conv weights and pack the tiny
    per-channel parameters into two small arrays (fewer per-step DMAs)."""
    C = p["w3"].shape[0]
    inv = p["gamma"] / jnp.sqrt(p["var"] + p["eps"])                    # (C,)

    # Conv2d weight [Cout, Cin, 3, 3] -> [Cout, dy, dx, Cin] -> (Cout, 9*Cin); columns are
    # tap-major (t = dy*3+dx) to match the kernel's tap loop; each output-channel row is
    # scaled by its BN factor.
    w3 = jnp.transpose(p["w3"], (0, 2, 3, 1)).reshape(C, 9 * C) * inv[:, None]
    w3 = w3.astype(jnp.bfloat16)

    bc = inv * (p["b3"] - p["mean"]) + p["beta"]                        # folded bias + BN shift
    cp = jnp.concatenate(
        [bc[:, None], p["a0"][:, None], p["b2"][:, None],
         jnp.transpose(p["w1"]),                                        # (C, Cr)
         p["w2"]], axis=1).astype(jnp.float32)                          # (C, 3 + 2*Cr)
    rp = jnp.stack([p["b1"], p["a1"]], axis=0).astype(jnp.float32)      # (2, Cr)
    return w3, cp, rp


def _lane_masks(H, W):
    """(2, H*W) bf16 masks killing the horizontally-invalid columns of the dx=0 (reads w-1)
    and dx=2 (reads w+1) conv taps."""
    w_idx = jnp.tile(jnp.arange(W, dtype=jnp.int32), H)
    keep_left = (w_idx >= 1)
    keep_right = (w_idx <= W - 2)
    return jnp.stack([keep_left, keep_right], axis=0).astype(jnp.bfloat16)


def ca_layer(x_nchw, raw_params, *, donate_input=False):
    """CALayer forward. x_nchw: [N, C, H, W] float32 -> [N, C, H, W] float32.

    The kernel works directly on the flattened NCHW layout (channel-major (C, H*W) tiles),
    so there is no HBM relayout on either side -- only free reshapes."""
    N, C, H, W = x_nchw.shape
    Cr = max(C // 8, 1)
    HW = H * W

    x = x_nchw.astype(jnp.float32).reshape(N, C, HW)   # free: NCHW is already channel-major
    w3, cp, rp = prepare_params(raw_params)
    lm = _lane_masks(H, W)

    # Explicit VMEM budget (v7x has only 64 MiB/core; 32 MiB scoped default).
    block_bytes = (2 * 2 * C * HW * 4                  # in + out blocks, double-buffered
                   + C * 9 * C * 2                     # conv weights (bf16)
                   + (C * (3 + 2 * Cr) + 2 * Cr) * 4   # packed params
                   + 2 * HW * 2                        # lane masks (bf16)
                   + C * (HW + 2 * W + 2) * 2)         # halo scratch (bf16)
    vmem_limit = int(min(max(4 * block_bytes, 1 << 20), 32 << 20))

    out = pl.pallas_call(
        functools.partial(_ca_layer_kernel, W=W),
        out_shape=jax.ShapeDtypeStruct((N, C, HW), jnp.float32),
        grid_spec=pltpu.PrefetchScalarGridSpec(
            num_scalar_prefetch=0,
            grid=(N,),
            in_specs=[
                pl.BlockSpec((1, C, HW), lambda n: (n, 0, 0)),    # image (channel-major)
                pl.BlockSpec((C, 9 * C), lambda n: (0, 0)),       # folded conv weights
                pl.BlockSpec((C, 3 + 2 * Cr), lambda n: (0, 0)),  # packed per-C params
                pl.BlockSpec((2, Cr), lambda n: (0, 0)),          # packed per-Cr params
                pl.BlockSpec((2, HW), lambda n: (0, 0)),          # conv lane masks
            ],
            out_specs=pl.BlockSpec((1, C, HW), lambda n: (n, 0, 0)),
            scratch_shapes=[
                pltpu.VMEM((C, HW + 2 * W + 2), jnp.bfloat16),    # zero-haloed image
            ],
        ),
        compiler_params=pltpu.CompilerParams(
            dimension_semantics=("parallel",),
            vmem_limit_bytes=vmem_limit),
        # Reuse x's HBM buffer for the output when the caller no longer needs x.
        input_output_aliases={0: 0} if donate_input else {},
    )(x, w3, cp, rp, lm)

    return out.reshape(N, C, H, W)


def ca_layer_ref(x, p):
    """Pure-JAX f32 reference of the PyTorch CALayer forward."""
    y = jax.lax.conv_general_dilated(x, p["w3"], (1, 1), "SAME",
                                     dimension_numbers=("NCHW", "OIHW", "NCHW"))
    y = y + p["b3"][None, :, None, None]
    inv = p["gamma"] / jnp.sqrt(p["var"] + p["eps"])
    y = (y - p["mean"][None, :, None, None]) * inv[None, :, None, None] \
        + p["beta"][None, :, None, None]
    y = jnp.where(y >= 0, y, p["a0"][None, :, None, None] * y)
    s = jnp.mean(y, axis=(2, 3), keepdims=True)
    z = jnp.einsum("rc,ncij->nrij", p["w1"], s) + p["b1"][None, :, None, None]
    z = jnp.where(z >= 0, z, p["a1"][None, :, None, None] * z)
    g = jax.nn.sigmoid(jnp.einsum("cr,nrij->ncij", p["w2"], z)
                       + p["b2"][None, :, None, None])
    return x * g


def init_raw_params(key, C):
    """Deterministic synthetic parameters in PyTorch-native layouts for CALayer(C)."""
    Cr = max(C // 8, 1)
    ks = jax.random.split(key, 10)
    return dict(
        # ca0: Conv2d(C, C, 3, padding=1, bias=True) + BatchNorm2d(C) + PReLU(C)
        w3=jax.random.normal(ks[0], (C, C, 3, 3), jnp.float32) * 0.1,
        b3=jax.random.normal(ks[1], (C,), jnp.float32) * 0.05,
        gamma=1.0 + 0.1 * jax.random.normal(ks[2], (C,), jnp.float32),
        beta=0.1 * jax.random.normal(ks[3], (C,), jnp.float32),
        mean=0.05 * jax.random.normal(ks[4], (C,), jnp.float32),
        var=1.0 + 0.1 * jax.random.uniform(ks[5], (C,), jnp.float32),
        eps=1e-5,
        a0=jnp.full((C,), 0.25, jnp.float32),          # PReLU(C) default init
        # ca: Conv2d(C, C//8, 1) + PReLU(C//8) + Conv2d(C//8, C, 1) + Sigmoid
        w1=jax.random.normal(ks[6], (Cr, C), jnp.float32) * 0.1,
        b1=0.05 * jax.random.normal(ks[8], (Cr,), jnp.float32),
        a1=jnp.full((Cr,), 0.25, jnp.float32),
        w2=jax.random.normal(ks[7], (C, Cr), jnp.float32) * 0.1,
        b2=0.05 * jax.random.normal(ks[9], (C,), jnp.float32),
    )


if __name__ == "__main__":
    key = jax.random.PRNGKey(0)
    k_x, k_p = jax.random.split(key)
    # C must be >= 8 so C // 8 >= 1; H*W = 256 keeps the gate multiply / final store
    # full-lane (multiple of 128 lanes).
    N, C, H, W = 2, 16, 16, 16
    x = jax.random.normal(k_x, (N, C, H, W), jnp.float32)
    params = init_raw_params(k_p, C)

    out = jax.block_until_ready(ca_layer(x, params))
    ref = ca_layer_ref(x, params)

    assert out.shape == (N, C, H, W)
    assert bool(jnp.all(jnp.isfinite(out)))
    # bf16 conv feeds only the pooled gate statistics, so end-to-end error is small.
    assert bool(jnp.allclose(out, ref, atol=5e-2, rtol=5e-2))
    print("KERNEL_OK")
</pallas_src>

<mosaic_0001>
module attributes {stable_mosaic.version = 11 : i64} {
  func.func @_ca_layer_kernel(%arg0: i32, %arg1: memref<1x16x256xf32, #tpu.memory_space<vmem>>, %arg2: memref<16x144xbf16, #tpu.memory_space<vmem>>, %arg3: memref<16x7xf32, #tpu.memory_space<vmem>>, %arg4: memref<2x2xf32, #tpu.memory_space<vmem>>, %arg5: memref<2x256xbf16, #tpu.memory_space<vmem>>, %arg6: memref<1x16x256xf32, #tpu.memory_space<vmem>>, %arg7: memref<16x290xbf16, #tpu.memory_space<vmem>>) attributes {dimension_semantics = [#tpu.dimension_semantics<parallel>], iteration_bounds = array<i64: 2>, scalar_prefetch = 0 : i64, scratch_operands = 1 : i64, tpu.core_type = #tpu.core_type<tc>, window_params = [{transform_indices = @transform_0, window_bounds = array<i64: 1, 16, 256>}, {pipeline_mode = #tpu.pipeline_mode<synchronous>, transform_indices = @transform_1, window_bounds = array<i64: 16, 144>}, {pipeline_mode = #tpu.pipeline_mode<synchronous>, transform_indices = @transform_2, window_bounds = array<i64: 16, 7>}, {pipeline_mode = #tpu.pipeline_mode<synchronous>, transform_indices = @transform_3, window_bounds = array<i64: 2, 2>}, {pipeline_mode = #tpu.pipeline_mode<synchronous>, transform_indices = @transform_4, window_bounds = array<i64: 2, 256>}, {transform_indices = @transform_5, window_bounds = array<i64: 1, 16, 256>}]} {
    %c0 = arith.constant 0 : index
    %c0_0 = arith.constant 0 : index
    %c0_1 = arith.constant 0 : index
    %0 = vector.load %arg1[%c0, %c0_0, %c0_1] : memref<1x16x256xf32, #tpu.memory_space<vmem>>, vector<1x16x256xf32>
    %1 = vector.shape_cast %0 : vector<1x16x256xf32> to vector<16x256xf32>
    %cst = arith.constant 0.000000e+00 : bf16
    %2 = vector.broadcast %cst : bf16 to vector<16x17xbf16>
    %c0_2 = arith.constant 0 : index
    %c0_3 = arith.constant 0 : index
    %3 = vector.load %arg7[%c0_2, %c0_3] : memref<16x290xbf16, #tpu.memory_space<vmem>>, vector<16x17xbf16>
    tpu.vector_store %arg7[%c0_2, %c0_3], %2 {strides = array<i32>} : memref<16x290xbf16, #tpu.memory_space<vmem>>, vector<16x17xbf16>,
    %cst_4 = arith.constant 0.000000e+00 : bf16
    %4 = vector.broadcast %cst_4 : bf16 to vector<16x17xbf16>
    %c0_5 = arith.constant 0 : index
    %c273 = arith.constant 273 : index
    %5 = vector.load %arg7[%c0_5, %c273] : memref<16x290xbf16, #tpu.memory_space<vmem>>, vector<16x17xbf16>
    tpu.vector_store %arg7[%c0_5, %c273], %4 {strides = array<i32>} : memref<16x290xbf16, #tpu.memory_space<vmem>>, vector<16x17xbf16>,
    %6 = arith.truncf %1 : vector<16x256xf32> to vector<16x256xbf16>
    %c0_6 = arith.constant 0 : index
    %c17 = arith.constant 17 : index
    %7 = vector.load %arg7[%c0_6, %c17] : memref<16x290xbf16, #tpu.memory_space<vmem>>, vector<16x256xbf16>
    tpu.vector_store %arg7[%c0_6, %c17], %6 {strides = array<i32>} : memref<16x290xbf16, #tpu.memory_space<vmem>>, vector<16x256xbf16>,
    %cst_7 = arith.constant 0.000000e+00 : f32
    %8 = vector.broadcast %cst_7 : f32 to vector<16x256xf32>
    %c0_8 = arith.constant 0 : index
    %c0_9 = arith.constant 0 : index
    %9 = vector.load %arg7[%c0_8, %c0_9] : memref<16x290xbf16, #tpu.memory_space<vmem>>, vector<16x256xbf16>
    %c0_10 = arith.constant 0 : index
    %c0_11 = arith.constant 0 : index
    %10 = vector.load %arg5[%c0_10, %c0_11] : memref<2x256xbf16, #tpu.memory_space<vmem>>, vector<1x256xbf16>
    %11 = vector.broadcast %10 : vector<1x256xbf16> to vector<16x256xbf16>
    %12 = arith.mulf %9, %11 : vector<16x256xbf16>
    %c0_12 = arith.constant 0 : index
    %c0_13 = arith.constant 0 : index
    %13 = vector.load %arg2[%c0_12, %c0_13] : memref<16x144xbf16, #tpu.memory_space<vmem>>, vector<16x16xbf16>
    %cst_14 = arith.constant dense<0.000000e+00> : vector<16x256xf32>
    %14 = tpu.matmul %13, %12, %cst_14 {dimension_numbers = #tpu.dot_dimension_numbers<[1], [0], [0], [1], [0, 0, 1, 1], [], []>} : vector<16x16xbf16>, vector<16x256xbf16>, vector<16x256xf32> -> vector<16x256xf32>
    %15 = arith.addf %8, %14 : vector<16x256xf32>
    %c0_15 = arith.constant 0 : index
    %c1 = arith.constant 1 : index
    %16 = vector.load %arg7[%c0_15, %c1] : memref<16x290xbf16, #tpu.memory_space<vmem>>, vector<16x256xbf16>
    %c0_16 = arith.constant 0 : index
    %c16 = arith.constant 16 : index
    %17 = vector.load %arg2[%c0_16, %c16] : memref<16x144xbf16, #tpu.memory_space<vmem>>, vector<16x16xbf16>
    %cst_17 = arith.constant dense<0.000000e+00> : vector<16x256xf32>
    %18 = tpu.matmul %17, %16, %cst_17 {dimension_numbers = #tpu.dot_dimension_numbers<[1], [0], [0], [1], [0, 0, 1, 1], [], []>} : vector<16x16xbf16>, vector<16x256xbf16>, vector<16x256xf32> -> vector<16x256xf32>
    %19 = arith.addf %15, %18 : vector<16x256xf32>
    %c0_18 = arith.constant 0 : index
    %c2 = arith.constant 2 : index
    %20 = vector.load %arg7[%c0_18, %c2] : memref<16x290xbf16, #tpu.memory_space<vmem>>, vector<16x256xbf16>
    %c1_19 = arith.constant 1 : index
    %c0_20 = arith.constant 0 : index
    %21 = vector.load %arg5[%c1_19, %c0_20] : memref<2x256xbf16, #tpu.memory_space<vmem>>, vector<1x256xbf16>
    %22 = vector.broadcast %21 : vector<1x256xbf16> to vector<16x256xbf16>
    %23 = arith.mulf %20, %22 : vector<16x256xbf16>
    %c0_21 = arith.constant 0 : index
    %c32 = arith.constant 32 : index
    %24 = vector.load %arg2[%c0_21, %c32] : memref<16x144xbf16, #tpu.memory_space<vmem>>, vector<16x16xbf16>
    %cst_22 = arith.constant dense<0.000000e+00> : vector<16x256xf32>
    %25 = tpu.matmul %24, %23, %cst_22 {dimension_numbers = #tpu.dot_dimension_numbers<[1], [0], [0], [1], [0, 0, 1, 1], [], []>} : vector<16x16xbf16>, vector<16x256xbf16>, vector<16x256xf32> -> vector<16x256xf32>
    %26 = arith.addf %19, %25 : vector<16x256xf32>
    %c0_23 = arith.constant 0 : index
    %c16_24 = arith.constant 16 : index
    %27 = vector.load %arg7[%c0_23, %c16_24] : memref<16x290xbf16, #tpu.memory_space<vmem>>, vector<16x256xbf16>
    %c0_25 = arith.constant 0 : index
    %c0_26 = arith.constant 0 : index
    %28 = vector.load %arg5[%c0_25, %c0_26] : memref<2x256xbf16, #tpu.memory_space<vmem>>, vector<1x256xbf16>
    %29 = vector.broadcast %28 : vector<1x256xbf16> to vector<16x256xbf16>
    %30 = arith.mulf %27, %29 : vector<16x256xbf16>
    %c0_27 = arith.constant 0 : index
    %c48 = arith.constant 48 : index
    %31 = vector.load %arg2[%c0_27, %c48] : memref<16x144xbf16, #tpu.memory_space<vmem>>, vector<16x16xbf16>
    %cst_28 = arith.constant dense<0.000000e+00> : vector<16x256xf32>
    %32 = tpu.matmul %31, %30, %cst_28 {dimension_numbers = #tpu.dot_dimension_numbers<[1], [0], [0], [1], [0, 0, 1, 1], [], []>} : vector<16x16xbf16>, vector<16x256xbf16>, vector<16x256xf32> -> vector<16x256xf32>
    %33 = arith.addf %26, %32 : vector<16x256xf32>
    %c0_29 = arith.constant 0 : index
    %c17_30 = arith.constant 17 : index
    %34 = vector.load %arg7[%c0_29, %c17_30] : memref<16x290xbf16, #tpu.memory_space<vmem>>, vector<16x256xbf16>
    %c0_31 = arith.constant 0 : index
    %c64 = arith.constant 64 : index
    %35 = vector.load %arg2[%c0_31, %c64] : memref<16x144xbf16, #tpu.memory_space<vmem>>, vector<16x16xbf16>
    %cst_32 = arith.constant dense<0.000000e+00> : vector<16x256xf32>
    %36 = tpu.matmul %35, %34, %cst_32 {dimension_numbers = #tpu.dot_dimension_numbers<[1], [0], [0], [1], [0, 0, 1, 1], [], []>} : vector<16x16xbf16>, vector<16x256xbf16>, vector<16x256xf32> -> vector<16x256xf32>
    %37 = arith.addf %33, %36 : vector<16x256xf32>
    %c0_33 = arith.constant 0 : index
    %c18 = arith.constant 18 : index
    %38 = vector.load %arg7[%c0_33, %c18] : memref<16x290xbf16, #tpu.memory_space<vmem>>, vector<16x256xbf16>
    %c1_34 = arith.constant 1 : index
    %c0_35 = arith.constant 0 : index
    %39 = vector.load %arg5[%c1_34, %c0_35] : memref<2x256xbf16, #tpu.memory_space<vmem>>, vector<1x256xbf16>
    %40 = vector.broadcast %39 : vector<1x256xbf16> to vector<16x256xbf16>
    %41 = arith.mulf %38, %40 : vector<16x256xbf16>
    %c0_36 = arith.constant 0 : index
    %c80 = arith.constant 80 : index
    %42 = vector.load %arg2[%c0_36, %c80] : memref<16x144xbf16, #tpu.memory_space<vmem>>, vector<16x16xbf16>
    %cst_37 = arith.constant dense<0.000000e+00> : vector<16x256xf32>
    %43 = tpu.matmul %42, %41, %cst_37 {dimension_numbers = #tpu.dot_dimension_numbers<[1], [0], [0], [1], [0, 0, 1, 1], [], []>} : vector<16x16xbf16>, vector<16x256xbf16>, vector<16x256xf32> -> vector<16x256xf32>
    %44 = arith.addf %37, %43 : vector<16x256xf32>
    %c0_38 = arith.constant 0 : index
    %c32_39 = arith.constant 32 : index
    %45 = vector.load %arg7[%c0_38, %c32_39] : memref<16x290xbf16, #tpu.memory_space<vmem>>, vector<16x256xbf16>
    %c0_40 = arith.constant 0 : index
    %c0_41 = arith.constant 0 : index
    %46 = vector.load %arg5[%c0_40, %c0_41] : memref<2x256xbf16, #tpu.memory_space<vmem>>, vector<1x256xbf16>
    %47 = vector.broadcast %46 : vector<1x256xbf16> to vector<16x256xbf16>
    %48 = arith.mulf %45, %47 : vector<16x256xbf16>
    %c0_42 = arith.constant 0 : index
    %c96 = arith.constant 96 : index
    %49 = vector.load %arg2[%c0_42, %c96] : memref<16x144xbf16, #tpu.memory_space<vmem>>, vector<16x16xbf16>
    %cst_43 = arith.constant dense<0.000000e+00> : vector<16x256xf32>
    %50 = tpu.matmul %49, %48, %cst_43 {dimension_numbers = #tpu.dot_dimension_numbers<[1], [0], [0], [1], [0, 0, 1, 1], [], []>} : vector<16x16xbf16>, vector<16x256xbf16>, vector<16x256xf32> -> vector<16x256xf32>
    %51 = arith.addf %44, %50 : vector<16x256xf32>
    %c0_44 = arith.constant 0 : index
    %c33 = arith.constant 33 : index
    %52 = vector.load %arg7[%c0_44, %c33] : memref<16x290xbf16, #tpu.memory_space<vmem>>, vector<16x256xbf16>
    %c0_45 = arith.constant 0 : index
    %c112 = arith.constant 112 : index
    %53 = vector.load %arg2[%c0_45, %c112] : memref<16x144xbf16, #tpu.memory_space<vmem>>, vector<16x16xbf16>
    %cst_46 = arith.constant dense<0.000000e+00> : vector<16x256xf32>
    %54 = tpu.matmul %53, %52, %cst_46 {dimension_numbers = #tpu.dot_dimension_numbers<[1], [0], [0], [1], [0, 0, 1, 1], [], []>} : vector<16x16xbf16>, vector<16x256xbf16>, vector<16x256xf32> -> vector<16x256xf32>
    %55 = arith.addf %51, %54 : vector<16x256xf32>
    %c0_47 = arith.constant 0 : index
    %c34 = arith.constant 34 : index
    %56 = vector.load %arg7[%c0_47, %c34] : memref<16x290xbf16, #tpu.memory_space<vmem>>, vector<16x256xbf16>
    %c1_48 = arith.constant 1 : index
    %c0_49 = arith.constant 0 : index
    %57 = vector.load %arg5[%c1_48, %c0_49] : memref<2x256xbf16, #tpu.memory_space<vmem>>, vector<1x256xbf16>
    %58 = vector.broadcast %57 : vector<1x256xbf16> to vector<16x256xbf16>
    %59 = arith.mulf %56, %58 : vector<16x256xbf16>
    %c0_50 = arith.constant 0 : index
    %c128 = arith.constant 128 : index
    %60 = vector.load %arg2[%c0_50, %c128] : memref<16x144xbf16, #tpu.memory_space<vmem>>, vector<16x16xbf16>
    %cst_51 = arith.constant dense<0.000000e+00> : vector<16x256xf32>
    %61 = tpu.matmul %60, %59, %cst_51 {dimension_numbers = #tpu.dot_dimension_numbers<[1], [0], [0], [1], [0, 0, 1, 1], [], []>} : vector<16x16xbf16>, vector<16x256xbf16>, vector<16x256xf32> -> vector<16x256xf32>
    %62 = arith.addf %55, %61 : vector<16x256xf32>
    %c0_52 = arith.constant 0 : index
    %c0_53 = arith.constant 0 : index
    %63 = vector.load %arg3[%c0_52, %c0_53] : memref<16x7xf32, #tpu.memory_space<vmem>>, vector<16x1xf32>
    %64 = vector.broadcast %63 : vector<16x1xf32> to vector<16x256xf32>
    %65 = arith.addf %62, %64 : vector<16x256xf32>
    %cst_54 = arith.constant 0.000000e+00 : f32
    %66 = vector.broadcast %cst_54 : f32 to vector<16x256xf32>
    %67 = arith.cmpf oge, %65, %66 : vector<16x256xf32>
    %c0_55 = arith.constant 0 : index
    %c1_56 = arith.constant 1 : index
    %68 = vector.load %arg3[%c0_55, %c1_56] : memref<16x7xf32, #tpu.memory_space<vmem>>, vector<16x1xf32>
    %69 = vector.broadcast %68 : vector<16x1xf32> to vector<16x256xf32>
    %70 = arith.mulf %69, %65 : vector<16x256xf32>
    %71 = arith.select %67, %65, %70 : vector<16x256xi1>, vector<16x256xf32>
    %cst_57 = arith.constant dense<0.000000e+00> : vector<16xf32>
    %72 = vector.multi_reduction <add>, %71, %cst_57 [1] : vector<16x256xf32> to vector<16xf32>
    %73 = vector.shape_cast %72 : vector<16xf32> to vector<16x1xf32>
    %cst_58 = arith.constant 3.906250e-03 : f32
    %74 = vector.broadcast %cst_58 : f32 to vector<16x1xf32>
    %75 = arith.mulf %73, %74 : vector<16x1xf32>
    %c0_59 = arith.constant 0 : index
    %c3 = arith.constant 3 : index
    %76 = vector.load %arg3[%c0_59, %c3] : memref<16x7xf32, #tpu.memory_space<vmem>>, vector<16x2xf32>
    %c0_60 = arith.constant 0 : index
    %c5 = arith.constant 5 : index
    %77 = vector.load %arg3[%c0_60, %c5] : memref<16x7xf32, #tpu.memory_space<vmem>>, vector<16x2xf32>
    %78 = vector.broadcast %75 : vector<16x1xf32> to vector<16x2xf32>
    %79 = arith.mulf %76, %78 : vector<16x2xf32>
    %cst_61 = arith.constant dense<0.000000e+00> : vector<2xf32>
    %80 = vector.multi_reduction <add>, %79, %cst_61 [0] : vector<16x2xf32> to vector<2xf32>
    %81 = vector.shape_cast %80 : vector<2xf32> to vector<1x2xf32>
    %c0_62 = arith.constant 0 : index
    %c0_63 = arith.constant 0 : index
    %82 = vector.load %arg4[%c0_62, %c0_63] : memref<2x2xf32, #tpu.memory_space<vmem>>, vector<1x2xf32>
    %83 = arith.addf %81, %82 : vector<1x2xf32>
    %cst_64 = arith.constant 0.000000e+00 : f32
    %84 = vector.broadcast %cst_64 : f32 to vector<1x2xf32>
    %85 = arith.cmpf oge, %83, %84 : vector<1x2xf32>
    %c1_65 = arith.constant 1 : index
    %c0_66 = arith.constant 0 : index
    %86 = vector.load %arg4[%c1_65, %c0_66] : memref<2x2xf32, #tpu.memory_space<vmem>>, vector<1x2xf32>
    %87 = arith.mulf %86, %83 : vector<1x2xf32>
    %88 = arith.select %85, %83, %87 : vector<1x2xi1>, vector<1x2xf32>
    %89 = vector.broadcast %88 : vector<1x2xf32> to vector<16x2xf32>
    %90 = arith.mulf %77, %89 : vector<16x2xf32>
    %cst_67 = arith.constant dense<0.000000e+00> : vector<16xf32>
    %91 = vector.multi_reduction <add>, %90, %cst_67 [1] : vector<16x2xf32> to vector<16xf32>
    %92 = vector.shape_cast %91 : vector<16xf32> to vector<16x1xf32>
    %c0_68 = arith.constant 0 : index
    %c2_69 = arith.constant 2 : index
    %93 = vector.load %arg3[%c0_68, %c2_69] : memref<16x7xf32, #tpu.memory_space<vmem>>, vector<16x1xf32>
    %94 = arith.addf %92, %93 : vector<16x1xf32>
    %95 = arith.negf %94 : vector<16x1xf32>
    %96 = math.exp %95 : vector<16x1xf32>
    %cst_70 = arith.constant 1.000000e+00 : f32
    %97 = vector.broadcast %cst_70 : f32 to vector<16x1xf32>
    %98 = arith.addf %97, %96 : vector<16x1xf32>
    %99 = arith.divf %97, %98 : vector<16x1xf32>
    %100 = vector.broadcast %99 : vector<16x1xf32> to vector<16x256xf32>
    %101 = arith.mulf %1, %100 : vector<16x256xf32>
    %c0_71 = arith.constant 0 : index
    %c0_72 = arith.constant 0 : index
    %c0_73 = arith.constant 0 : index
    %102 = vector.load %arg6[%c0_71, %c0_72, %c0_73] : memref<1x16x256xf32, #tpu.memory_space<vmem>>, vector<1x16x256xf32>
    %103 = vector.shape_cast %102 : vector<1x16x256xf32> to vector<16x256xf32>
    %104 = vector.shape_cast %101 : vector<16x256xf32> to vector<1x16x256xf32>
    tpu.vector_store %arg6[%c0_71, %c0_72, %c0_73], %104 {strides = array<i32>} : memref<1x16x256xf32, #tpu.memory_space<vmem>>, vector<1x16x256xf32>,
    return
  }
  func.func @transform_0(%arg0: i32) -> (i32, i32, i32) {
    %c0_i32 = arith.constant 0 : i32
    %c0_i32_0 = arith.constant 0 : i32
    %c0_i32_1 = arith.constant 0 : i32
    return %arg0, %c0_i32, %c0_i32_0 : i32, i32, i32
  }
  func.func @transform_1(%arg0: i32) -> (i32, i32) {
    %c0_i32 = arith.constant 0 : i32
    %c0_i32_0 = arith.constant 0 : i32
    %c0_i32_1 = arith.constant 0 : i32
    return %c0_i32, %c0_i32_0 : i32, i32
  }
  func.func @transform_2(%arg0: i32) -> (i32, i32) {
    %c0_i32 = arith.constant 0 : i32
    %c0_i32_0 = arith.constant 0 : i32
    %c0_i32_1 = arith.constant 0 : i32
    return %c0_i32, %c0_i32_0 : i32, i32
  }
  func.func @transform_3(%arg0: i32) -> (i32, i32) {
    %c0_i32 = arith.constant 0 : i32
    %c0_i32_0 = arith.constant 0 : i32
    %c0_i32_1 = arith.constant 0 : i32
    return %c0_i32, %c0_i32_0 : i32, i32
  }
  func.func @transform_4(%arg0: i32) -> (i32, i32) {
    %c0_i32 = arith.constant 0 : i32
    %c0_i32_0 = arith.constant 0 : i32
    %c0_i32_1 = arith.constant 0 : i32
    return %c0_i32, %c0_i32_0 : i32, i32
  }
  func.func @transform_5(%arg0: i32) -> (i32, i32, i32) {
    %c0_i32 = arith.constant 0 : i32
    %c0_i32_0 = arith.constant 0 : i32
    %c0_i32_1 = arith.constant 0 : i32
    return %arg0, %c0_i32, %c0_i32_0 : i32, i32, i32
  }
}

</mosaic_0001>

<bundles_post_ra>
// kernel: tpu_custom_call.1
= control target key start
LH: loop header
LB: loop body
LE: loop exit
PB: predicated region body
PF: predicated region fallthrough
CT: control target
= control target key end

     0   :  { %10 = vsyncpa [#allocation4], 0  ;;  %s1841_s0 = inlined_call_operand.hbm [shape: f32[2,16,256], index: 0, kind: input, shape index: {}]   ;;  %s1842_s1 = inlined_call_operand.vmem [shape: bf16[16,144], index: 1, kind: input, shape index: {}]   ;;  %s1843_s2 = inlined_call_operand.vmem [shape: f32[16,7], index: 2, kind: input, shape index: {}]   ;;  %s1844_s3 = inlined_call_operand.vmem [shape: f32[2,2], index: 3, kind: input, shape index: {}]   ;;  %s1845_s4 = inlined_call_operand.vmem [shape: bf16[2,256], index: 4, kind: input, shape index: {}]   ;;  %s1846_s5 = inlined_call_operand.hbm [shape: f32[2,16,256], index: 5, kind: output, shape index: {}]  }
   0x1   :  { %12 = vsyncpa [#allocation4 + $0x1], 0 }
   0x2   :  { %13 = vsyncpa [#allocation5], 0 }
   0x3   :  { %15 = vsyncpa [#allocation5 + $0x1], 0  ;;  %s1496_s18 = smov 0   ;;  %s1498_s19 = smov 0  }
   0x4   :  { %s1500_s20 = smov 0   ;;  %s1502_s21 = smov 0  }
   0x5 LB: > { %s1517_s22 = sadd.s32 4294967295, %s1438_s21   ;;  %s1147_s23 = sadd.s32 4294967294, %s1438_s21   ;;  %s1438_s21 = sphi %s1502_s21, %s1856_s21   ;;  %s1434_s20 = sphi %s1500_s20, %s1855_s20   ;;  %s1430_s19 = sphi %s1498_s19, %s1854_s19   ;;  %s1426_s18 = sphi %s1496_s18, %s1853_s18  }
   0x6   : > { %s1521_s24 = sadd.s32 1, %s1438_s21   ;;  %s28_s25 = sadd.s32 1, %s1434_s20 }
   0x7   : > { %s25_s26 = ssub.s32 %s1438_s21, %s1521_s24  ;;  %p35_p0 = scmp.ne.s32.totalorder %s1434_s20, %s1430_s19 }
   0x8   : > { %p26_p1 = scmp.eq.s32.totalorder %s25_s26, 0  ;;  %p36_p2 = scmp.eq.s32.totalorder %s1438_s21, 0 }
   0x9   : > { %p41_p3 = scmp.ne.s32.totalorder %s1430_s19, %s1426_s18  ;;  %p42_p4 = scmp.eq.s32.totalorder %s1517_s22, 0 }
   0xa   : > { %s1533_s27 = scalar_select %p26_p1, %s1434_s20, %s28_s25  }
   0xb   : > { %p1535_p5 = por %p36_p2, %p35_p0  ;;  %p1539_p6 = por %p42_p4, %p41_p3 }
   0xc   : > { %p149_p7 = scmp.eq.s32.totalorder %s1517_s22, 1  ;;  %p155_p8 = scmp.eq.s32.totalorder %s1147_s23, 1 }
   0xd   : > { %p1240_p10 = scmp.lt.s32.totalorder %s1438_s21, 2  ;;  %s187_s7 = sand.u32 1, %s1434_s20  }
   0xe   : > { %p1546_p11 = por %p149_p7, %p35_p0  ;;  %p1550_p12 = por %p155_p8, %p41_p3 }
   0xf   : > { %s1217_s8 = sshll.u32 %s1438_s21, 5  ;;  %s1150_s9 = sshll.u32 %s187_s7, 5 }
  0x10   : > { %s196_s12 = scalar_lea.hbm %s1841_s0, %s1217_s8  ;;  %s191_s14 = scalar_lea.vmem [#allocation3], %s1150_s9 }
  0x11   : > { %s197_s13 = sshll.u32 %s196_s12, 4  ;;  %s199_s15 = sshll.u32 %s191_s14, 4  ;;  %s198_s13 = int_to_ptr.hbm [resolvable:$true] %s197_s13  ;;  %s200_s15 = int_to_ptr.vmem [resolvable:$true] %s199_s15 }
  0x12   : > { %p1561_p13 = pnand %p1240_p10, %p1535_p5  ;;  %p1153_p0 = scmp.ge.s32.totalorder %s1438_s21, 1 }
  0x13   : > { %p207_p1 = scmp.lt.s32.totalorder %s1438_s21, 3  ;;  %s188_s17 = scalar_lea.sflag [#allocation4], %s187_s7 }
  0x14   : > { %s1342_s23 = sshra.s32 %s198_s13, 4  ;;  %p1346_p3 = pneg %p1561_p13  ;;  %s1343_s23 = int_to_ptr.hbm [resolvable:$true] %s1342_s23 }
  0x15   : > { %s1344_s25 = scalar_lea.hbm %s1343_s23, 32  ;;  %s1349_s28 = scalar_lea.hbm %s1841_s0, 64 }
  0x16   : > { %p1345_p2 = scmp.ne.s32.totalorder %s1343_s23, %s1344_s25  ;;  %p1350_p5 = scmp.lt.s32.totalorder %s1343_s23, %s1841_s0 }
  0x17   : > { %p1351_p8 = scmp.lt.s32.totalorder %s1349_s28, %s1344_s25 }
  0x18   : > { %p1347_p4 = pnand %p1346_p3, %p1345_p2 }
  0x19   : > { %p1352_p10 = por %p1351_p8, %p1350_p5 }
  0x1a   : > { %p1348_p7 = pneg %p1347_p4 }
  0x1c   : > { %p1353_p9 = pnand %p1352_p10, %p1348_p7 }
  0x1e   : > { %1356 = shalt.err (!%p1353_p9)
}
  0x1f   : > { %s1440_s7 = smov 256   ;;  %s1441_s11 = smov 16  }
  0x20   : > { %1235 = dma.hbm_to_vmem [thread:$0]  (!%p1561_p13), %s198_s13, 512, %s200_s15, %s188_s17, %s1440_s7, %s1440_s7, %s1441_s11  }
  0x21   : > { %p208_p2 = pnand %p1153_p0, %p207_p1 }
  0x22   : > { %s1582_s12 = sand.u32 (!%p208_p2), 1, %s1430_s19  }
  0x23   : > { %211 = sbr.rel (%p208_p2) target bundleno = 1390 (0x56e), region = 40  ;;  %s1154_s14 = sshll.u32 (!%p208_p2), %s1582_s12, 5 }
  0x24   : > { %s214_s23 = scalar_lea.sflag (!%p208_p2), [#allocation4], %s1582_s12  ;;  %s1588_s25 = scalar_lea.vmem (!%p208_p2), [#allocation3], %s1154_s14 }
  0x28   : > { %1417 = dma.done.wait (%p1539_p6), %s214_s23, 512  }
  0x29   : > { %1419 = vsyncadd (%p1539_p6), %s214_s23, 4294966784  ;;  %v246_v0 = vld [vmem:[%s1588_s25] sm:$0xff]  ;;  %v247_v1 = vld [vmem:[%s1588_s25 + $0x8] sm:$0xff]  ;;  %s1442_s29 = smov 17   ;;  %s1443_s28 = smov 112   ;;  %vm250_vm0 = vcmask 134144  }
  0x2a   : > { %v256_v2 = vpack.c.bf16 %v247_v1, %v246_v0  ;;  %v282_v3 = vld [vmem:[%s1845_s4] sm:$0x3]  ;;  %v1218_v5 = vld [vmem:[%s1842_s1 + $0x4] sm:$0xf0]  ;;  %v1608_v7 = vld [vmem:[%s1588_s25 + $0x10] sm:$0xff]  ;;  %s1444_s7 = smov 32  }
  0x2b   : > { %284 = vst [vmem:[#allocation1] ss:$9 sm:$0xff] %v282_v3  ;;  %v1158_v4 = vld [vmem:[%s1842_s1] sm:$0xf]  ;;  %v1611_v8 = vld [vmem:[%s1588_s25 + $0x18] sm:$0xff]  ;;  %s1445_s11 = smov 2  }
  0x2c   : > { %260 = vrot.lane.b32.xlu0 %v256_v2, %s1442_s29  ;;  %v1605_v6 = vor.u32 %v1218_v5, %v1158_v4  ;;  %v257_v9 = vpack.c.bf16 %v1611_v8, %v1608_v7  ;;  %v405_v10 = vld [vmem:[%s1845_s4] sm:$0x3]  ;;  %s1446_s23 = smov 18   ;;  %s1447_s13 = smov 16   ;;  %vm253_vm1 = vcmask 273544   ;;  %v1449_v31 = vmov 0  }
  0x2d   : > { %s1448_s15 = smov 34   ;;  %251 = vst.msk [vmem:[#allocation2] sm:$0xf] %vm250_vm0, %v1449_v31  ;;  %1326 = vset.pattern.permute.xlu0 %v1449_v31  ;;  %1325 = vset.pattern.permute.xlu2 %v1449_v31  ;;  %v1178_v32 = vld [vmem:[%s1842_s1] sm:$0xf]  ;;  %s1451_s9 = smov 80  }
  0x2e   : > { %316 = vrot.lane.b32.xlu2 %v1605_v6, %s1443_s28  ;;  %254 = vst.msk [vmem:[#allocation2 + $0x8] sm:$0xf] %vm253_vm1, %v1449_v31  ;;  %v1222_v33 = vld [vmem:[%s1842_s1 + $0x4] sm:$0xf0]  ;;  %vm273_vm2 = vcmask 1043592   ;;  %vm274_vm3 = vcmask 1047556  }
  0x2f   : > { %252 = vst.msk [vmem:[#allocation2 + $0xc] sm:$0xf] %vm250_vm0, %v1449_v31  ;;  %v1637_v34 = vor.u32 %v1222_v33, %v1178_v32  ;;  %vm266_vm4 = vcmask 138240   ;;  %vm275_vm5 = vmor %vm274_vm3, %vm273_vm2  ;;  %s1452_s10 = smov 127   ;;  %vm835_vm6 = vcmask 277504   ;;  %vm342_vm7 = vcmask 130048  }
  0x30   : > { %255 = vst.msk [vmem:[#allocation2 + $0x14] sm:$0xf] %vm253_vm1, %v1449_v31  ;;  %vm432_vm8 = vcmask 15360   ;;  %vm649_vm9 = vcmask 146432   ;;  %vm718_vm10 = vcmask 261120   ;;  %s1456_s16 = smov 110  }
  0x31   : > { %s1457_s17 = smov 48   ;;  %s1458_s26 = smov 95   ;;  %vm337_vm11 = vcmask 1039360   ;;  %vm544_vm12 = vcmask 916480   ;;  %vm464_vm13 = vcmask 1031168   ;;  %vm605_vm14 = vcmask 908288  }
  0x32   : > { %v285_v11 = vld [vmem:[#allocation1] sm:$0xff]  ;;  %v286_v12 = vld [vmem:[#allocation1 + $0x9] sm:$0xff]  ;;  %s1459_s8 = smov 94   ;;  %vm674_vm15 = vcmask 900096   ;;  %vm791_vm1 = vcmask 777216   ;;  %vm865_vm2 = vcmask 769024  }
  0x33   : > { %v287_v13 = vpack.i.b16 %v285_v11, %v285_v11  ;;  %v290_v14 = vpack.i.b16 %v286_v12, %v286_v12  ;;  %407 = vst [vmem:[#allocation1] ss:$9 sm:$0xff] %v405_v10 }
  0x34   : > { %262 = vrot.lane.b32.xlu0 %v257_v9, %s1442_s29  ;;  %s1450_s29 = smov 96  }
  0x35   : > { %v289_v15 = vperm.slane %v287_v13, 0  ;;  %v292_v16 = vperm.slane %v290_v14, 0 }
  0x37   : > { %v1620_v17 = vunpack.c.l.bf16 %v289_v15  ;;  %v1622_v18 = vunpack.c.l.bf16 %v292_v16 }
  0x39   : > { %v1310_v19 = vpack.i.bf16 %v1622_v18, %v1620_v17 }
  0x3a   : > { %v408_v20 = vld [vmem:[#allocation1] sm:$0xff]  ;;  %v409_v21 = vld [vmem:[#allocation1 + $0x9] sm:$0xff] }
  0x3b   : > { %v410_v22 = vshrl.u32 %v408_v20, 16  ;;  %v414_v23 = vshrl.u32 %v409_v21, 16 }
  0x3c   : > { %1311 = vrot.lane.b32.xlu0 %v1310_v19, %s1444_s7 }
  0x3d   : > { %v411_v24 = vpack.i.b16 %v410_v22, %v410_v22  ;;  %v415_v25 = vpack.i.b16 %v414_v23, %v414_v23 }
  0x3f   : > { %v413_v26 = vperm.slane %v411_v24, 0  ;;  %v417_v27 = vperm.slane %v415_v25, 0 }
  0x41   : > { %v424_v28 = vunpack.c.l.bf16 %v413_v26  ;;  %v425_v29 = vunpack.c.l.bf16 %v417_v27 }
  0x43   : > { %v1300_v30 = vpack.i.bf16 %v425_v29, %v424_v28 }
  0x44   : > { %533 = vrot.lane.b32.xlu0 %v1637_v34, %s1451_s9  ;;  %s1392_s9 = scalar_lea.hbm %s1846_s5, 64 }
  0x45   : > { %1301 = vrot.lane.b32.xlu1 %v1300_v30, %s1445_s11  ;;  %1316 = vrot.lane.b32.xlu2 %v1300_v30, %s1446_s23  ;;  %s1453_s23 = smov 111  }
  0x4d   : > { %1306 = vrot.lane.b32.xlu1 %v1310_v19, %s1447_s13  ;;  %1321 = vrot.lane.b32.xlu2 %v1300_v30, %s1448_s15  ;;  %s1454_s15 = smov 126  }
  0x55   : > { %453 = vrot.lane.b32.xlu1 %v1637_v34, %s1450_s29 }
  0x88   : > { %v1642_v35 = vpop.permute.xlu2 %316 }
  0x9e   : > { %v261_v36 = vpop.permute.xlu0 %260 }
  0x9f   : > { %v264_v37 = vrot.slane %v261_v36, 4  ;;  %v1645_v39 = vpop.permute.xlu2 %1316 }
  0xa1   : > { %v267_v38 = vsel %vm266_vm4, %v264_v37, %v261_v36  ;;  %277 = vst.msk [vmem:[#allocation2 + $0x8] sm:$0xf] %vm250_vm0, %v264_v37 }
  0xa2   : > { %276 = vst.msk [vmem:[#allocation2] sm:$0xff] %vm275_vm5, %v267_v38 }
  0xa6   : > { %v263_v40 = vpop.permute.xlu0 %262 }
  0xa7   : > { %v265_v41 = vrot.slane %v263_v40, 4  ;;  %v1322_v46 = vpop.permute.xlu2 %1321 }
  0xa8   : > { %v1170_v44 = vld [vmem:[#allocation2 + $0x8] sm:$0xf]  ;;  %v1656_v59 = vunpack.i.h.bf16 %v1322_v46  ;;  %v1323_v60 = vunpack.i.l.bf16 %v1322_v46 }
  0xa9   : > { %v268_v42 = vsel %vm266_vm4, %v265_v41, %v263_v40  ;;  %279 = vst.msk [vmem:[#allocation2 + $0x14] sm:$0xf] %vm250_vm0, %v265_v41  ;;  %v280_v43 = vld [vmem:[#allocation2] sm:$0xff]  ;;  %v308_v33 = vld [vmem:[#allocation2 + $0x8] sm:$0xf]  ;;  %vm743_vm0 = vcmask 785408  }
  0xaa   : > { %278 = vst.msk [vmem:[#allocation2 + $0xc] sm:$0xff] %vm275_vm5, %v268_v42  ;;  %v1648_v45 = vunpack.c.l.bf16 %v280_v43  ;;  %v1162_v48 = vld [vmem:[#allocation2] sm:$0xf]  ;;  %v1219_v49 = vld [vmem:[#allocation2 + $0x4] sm:$0xf]  ;;  %v1650_v50 = vunpack.c.h.bf16 %v280_v43  ;;  %v836_v4 = vsel %vm835_vm6, %v1323_v60, %v1656_v59  ;;  %v420_v41 = vunpack.c.l.bf16 %v308_v33 }
  0xab   : > { %v1186_v9 = vld [vmem:[#allocation2] sm:$0xf] }
  0xac   : > { %v299_v61 = vmul.f32 %v1620_v17, %v1648_v45  ;;  %v300_v63 = vmul.f32 %v1622_v18, %v1650_v50  ;;  %v1676_v13 = vmul.f32 %v1323_v60, %v1648_v45  ;;  %v1679_v14 = vmul.f32 %v836_v4, %v1650_v50 }
  0xb0   : > { %v1221_v47 = vld [vmem:[#allocation2 + $0x10] sm:$0xf0] }
  0xb1   : > { %v1171_v51 = vor.u32 %v1221_v47, %v1170_v44  ;;  %v1220_v52 = vld [vmem:[#allocation2 + $0x8] sm:$0xf0]  ;;  %v1164_v53 = vld [vmem:[#allocation2 + $0xc] sm:$0xf0]  ;;  %v310_v36 = vld [vmem:[#allocation2 + $0x14] sm:$0xf] }
  0xb2   : > { %v281_v54 = vld [vmem:[#allocation2 + $0xc] sm:$0xff]  ;;  %v1163_v55 = vor.u32 %v1220_v52, %v1162_v48  ;;  %v1167_v56 = vor.u32 %v1219_v49, %v1164_v53  ;;  %v423_v42 = vunpack.c.l.bf16 %v310_v36 }
  0xb3   : > { %v1652_v57 = vunpack.c.l.bf16 %v281_v54  ;;  %v1654_v58 = vunpack.c.h.bf16 %v281_v54  ;;  %335 = vrot.lane.b32.xlu1 %v1171_v51, %s1452_s10  ;;  %v1224_v3 = vld [vmem:[#allocation2 + $0x8] sm:$0xf0]  ;;  %v1188_v54 = vld [vmem:[#allocation2 + $0xc] sm:$0xf0] }
  0xb4   : > { %331 = vrot.lane.b32.xlu2 %v1163_v55, %s1452_s10  ;;  %333 = vrot.lane.b32.xlu0 %v1167_v56, %s1452_s10  ;;  %v1667_v10 = vor.u32 %v1224_v3, %v1186_v9  ;;  %v1225_v55 = vld [vmem:[#allocation2 + $0x10] sm:$0xf0]  ;;  %v1223_v56 = vld [vmem:[#allocation2 + $0x4] sm:$0xf]  ;;  %s1463_s10 = smov 123  }
  0xb5   : > { %v301_v62 = vmul.f32 %v1620_v17, %v1652_v57  ;;  %v302_v0 = vmul.f32 %v1622_v18, %v1654_v58  ;;  %v1670_v11 = vmul.f32 %v1323_v60, %v1652_v57  ;;  %v1673_v12 = vmul.f32 %v836_v4, %v1654_v58  ;;  %v505_v17 = vld [vmem:[#allocation2 + $0x8] sm:$0xf]  ;;  %v507_v18 = vld [vmem:[#allocation2 + $0x14] sm:$0xf]  ;;  %v1312_v60 = vpop.permute.xlu0 %1311 }
  0xb6   : > { %v1691_v22 = vunpack.c.l.bf16 %v505_v17  ;;  %v1693_v23 = vunpack.c.l.bf16 %v507_v18 }
  0xb7   : > { %v303_v1 = vpack.c.bf16 %v301_v62, %v299_v61  ;;  %v304_v2 = vpack.c.bf16 %v302_v0, %v300_v63  ;;  %v1302_v5 = vpop.permute.xlu1 %1301  ;;  %v846_v15 = vpack.c.bf16 %v1670_v11, %v1676_v13  ;;  %v847_v16 = vpack.c.bf16 %v1673_v12, %v1679_v14  ;;  %v1194_v61 = vld [vmem:[#allocation2 + $0x8] sm:$0xf] }
  0xb8   : > { %v1304_v24 = vunpack.i.h.bf16 %v1302_v5  ;;  %v1303_v25 = vunpack.i.l.bf16 %v1302_v5  ;;  %v1191_v62 = vor.u32 %v1223_v56, %v1188_v54  ;;  %v1195_v63 = vor.u32 %v1225_v55, %v1194_v61  ;;  %v1759_v54 = vld [vmem:[%s1843_s2] sm:$0xff]  ;;  %v1764_v55 = vld [vmem:[%s1843_s2 + $0x8] sm:$0xff] }
  0xb9   : > { %384 = vmatpush.bf16.msra.mxu2 %v303_v1  ;;  %398 = vmatpush.bf16.msra.mxu3 %v304_v2  ;;  %v1318_v0 = vunpack.i.l.bf16 %v1645_v39  ;;  %v1319_v1 = vunpack.i.h.bf16 %v1645_v39  ;;  %v1313_v2 = vunpack.i.l.bf16 %v1312_v60  ;;  %v1460_v56 = vmov 1  }
  0xba   : > { %v433_v37 = vsel %vm432_vm8, %v1303_v25, %v1304_v24  ;;  %v439_v46 = vmul.f32 %v1304_v24, %v420_v41  ;;  %v442_v47 = vmul.f32 %v1304_v24, %v423_v42  ;;  %v437_v48 = vmul.f32 %v1303_v25, %v1648_v45  ;;  %1327 = vset.pattern.permute.xlu1 %v1460_v56 }
  0xbb   : > { %599 = vrot.lane.b32.xlu1 %v1667_v10, %s1453_s23  ;;  %v438_v43 = vmul.f32 %v433_v37, %v1650_v50  ;;  %v441_v44 = vmul.f32 %v433_v37, %v1654_v58  ;;  %v440_v49 = vmul.f32 %v1303_v25, %v1652_v57  ;;  %v657_v3 = vmul.f32 %v1318_v0, %v1652_v57 }
  0xbc   : > { %1174 = vmatmul.msk.bf16.vlgmr.msra.gmra.mxu2 %vm342_vm7, %v1605_v6  ;;  %1175 = vmatmul.msk.bf16.vlgmr.msra.gmra.mxu3 %vm342_vm7, %v1605_v6  ;;  %v445_v52 = vpack.c.bf16 %v442_v47, %v439_v46  ;;  %v726_v4 = vmul.f32 %v1313_v2, %v1652_v57  ;;  %v659_v5 = vmul.f32 %v1319_v1, %v1693_v23 }
  0xbd   : > { %v444_v51 = vpack.c.bf16 %v441_v44, %v438_v43  ;;  %v443_v53 = vpack.c.bf16 %v440_v49, %v437_v48  ;;  %v654_v9 = vmul.f32 %v1318_v0, %v1648_v45  ;;  %v723_v17 = vmul.f32 %v1313_v2, %v1648_v45 }
  0xbe   : > { %v656_v18 = vmul.f32 %v1319_v1, %v1691_v22 }
  0xbf   : > { %v1307_v19 = vpop.permute.xlu1 %1306  ;;  %v660_v39 = vpack.c.bf16 %v657_v3, %v654_v9 }
  0xc0   : > { %v1309_v20 = vunpack.i.h.bf16 %v1307_v19  ;;  %v1308_v21 = vunpack.i.l.bf16 %v1307_v19  ;;  %v1314_v19 = vunpack.i.h.bf16 %v1312_v60 }
  0xc2   : > { %v520_v26 = vsel %vm342_vm7, %v1308_v21, %v1309_v20  ;;  %v526_v27 = vmul.f32 %v1309_v20, %v1691_v22  ;;  %v529_v28 = vmul.f32 %v1309_v20, %v1693_v23  ;;  %v524_v29 = vmul.f32 %v1308_v21, %v1648_v45 }
  0xc3   : > { %v527_v6 = vmul.f32 %v1308_v21, %v1652_v57  ;;  %v525_v30 = vmul.f32 %v520_v26, %v1650_v50  ;;  %v528_v31 = vmul.f32 %v520_v26, %v1654_v58  ;;  %v729_v20 = vpack.c.bf16 %v726_v4, %v723_v17 }
  0xc4   : > { %v532_v32 = vpack.c.bf16 %v529_v28, %v526_v27  ;;  %v662_v21 = vpack.c.bf16 %v659_v5, %v656_v18  ;;  %v650_v57 = vsel %vm649_vm9, %v1318_v0, %v1319_v1  ;;  %v719_v24 = vsel %vm718_vm10, %v1313_v2, %v1314_v19 }
  0xc5   : > { %v530_v38 = vpack.c.bf16 %v527_v6, %v524_v29  ;;  %v531_v40 = vpack.c.bf16 %v528_v31, %v525_v30  ;;  %v658_v25 = vmul.f32 %v650_v57, %v1654_v58  ;;  %v727_v26 = vmul.f32 %v719_v24, %v1654_v58 }
  0xc6   : > { %542 = vrot.lane.b32.xlu2 %v532_v32, %s1443_s28  ;;  %v655_v45 = vmul.f32 %v650_v57, %v1650_v50  ;;  %v724_v27 = vmul.f32 %v719_v24, %v1650_v50  ;;  %v728_v6 = vmul.f32 %v1314_v19, %v1693_v23  ;;  %v725_v30 = vmul.f32 %v1314_v19, %v1691_v22  ;;  %v1206_v19 = vld [vmem:[%s1842_s1 + $0x4] sm:$0xf] }
  0xc7   : > { %538 = vrot.lane.b32.xlu0 %v530_v38, %s1443_s28  ;;  %540 = vrot.lane.b32.xlu1 %v531_v40, %s1443_s28  ;;  %s1455_s28 = smov 64   ;;  %v845_v50 = vmul.f32 %v1656_v59, %v1693_v23  ;;  %v842_v58 = vmul.f32 %v1656_v59, %v1691_v22 }
  0xc8   : > { %v661_v28 = vpack.c.bf16 %v658_v25, %v655_v45  ;;  %v730_v29 = vpack.c.bf16 %v727_v26, %v724_v27  ;;  %v731_v31 = vpack.c.bf16 %v728_v6, %v725_v30 }
  0xc9   : > { %v848_v32 = vpack.c.bf16 %v845_v50, %v842_v58 }
  0xce   : > { %460 = vrot.lane.b32.xlu2 %v444_v51, %s1454_s15 }
  0xcf   : > { %462 = vrot.lane.b32.xlu0 %v445_v52, %s1454_s15  ;;  %458 = vrot.lane.b32.xlu1 %v443_v53, %s1454_s15 }
  0xd6   : > { %601 = vrot.lane.b32.xlu2 %v1191_v62, %s1453_s23 }
  0xd7   : > { %603 = vrot.lane.b32.xlu0 %v1195_v63, %s1453_s23  ;;  %584 = vrot.lane.b32.xlu1 %v1637_v34, %s1455_s28  ;;  %s1227_s23 = sshll.u32 %s1517_s22, 5 }
  0xde   : > { %668 = vrot.lane.b32.xlu2 %v660_v39, %s1456_s16  ;;  %v1226_v39 = vld [vmem:[%s1842_s1 + $0x8] sm:$0xf0] }
  0xdf   : > { %737 = vrot.lane.b32.xlu0 %v729_v20, %s1450_s29  ;;  %672 = vrot.lane.b32.xlu1 %v662_v21, %s1456_s16  ;;  %v1207_v26 = vor.u32 %v1226_v39, %v1206_v19 }
  0xe6   : > { %663 = vrot.lane.b32.xlu2 %v1637_v34, %s1457_s17 }
  0xe7   : > { %670 = vrot.lane.b32.xlu0 %v661_v28, %s1456_s16  ;;  %739 = vrot.lane.b32.xlu1 %v730_v29, %s1450_s29  ;;  %s1070_s16 = scalar_lea.hbm %s1846_s5, %s1227_s23 }
  0xee   : > { %741 = vrot.lane.b32.xlu2 %v731_v31, %s1450_s29 }
  0xef   : > { %732 = vrot.lane.b32.xlu0 %v1637_v34, %s1444_s7  ;;  %785 = vrot.lane.b32.xlu1 %v1667_v10, %s1458_s26  ;;  %v454_v10 = vpop.permute.xlu1 %453  ;;  %s1462_s7 = smov 125  }
  0xf6   : > { %787 = vrot.lane.b32.xlu2 %v1191_v62, %s1458_s26 }
  0xf7   : > { %789 = vrot.lane.b32.xlu0 %v1195_v63, %s1458_s26  ;;  %783 = vrot.lane.b32.xlu1 %v1637_v34, %s1447_s13  ;;  %v534_v34 = vpop.permute.xlu0 %533  ;;  %s1073_s26 = sshll.u32 %s1070_s16, 4  ;;  %s1074_s26 = int_to_ptr.hbm [resolvable:$true] %s1073_s26 }
  0xfe   : > { %859 = vrot.lane.b32.xlu2 %v846_v15, %s1459_s8 }
  0xff   : > { %861 = vrot.lane.b32.xlu0 %v847_v16, %s1459_s8  ;;  %863 = vrot.lane.b32.xlu1 %v848_v32, %s1459_s8  ;;  %s1461_s8 = smov 3  }
 0x106   : > { %909 = vperm.xlu2 %1325, %v1759_v54  }
 0x107   : > { %914 = vperm.xlu0 %1326, %v1764_v55   ;;  %926 = vperm.xlu1 %1327, %v1759_v54  }
 0x10e   : > { %v332_v33 = vpop.permute.xlu2 %331  ;;  %1328 = vset.pattern.permute.xlu2 %v1460_v56 }
 0x10f   : > { %930 = vperm.xlu2 %1328, %v1764_v55  }
 0x120   : > { %v543_v36 = vpop.permute.xlu2 %542 }
 0x125   : > { %v336_v23 = vpop.permute.xlu1 %335 }
 0x126   : > { %v334_v37 = vpop.permute.xlu0 %333 }
 0x127   : > { %v338_v38 = vsel %vm337_vm11, %v332_v33, %v334_v37  ;;  %v339_v59 = vsel %vm337_vm11, %v334_v37, %v336_v23 }
 0x128   : > { %353 = vmatpush.bf16.msra.mxu0 %v338_v38  ;;  %367 = vmatpush.bf16.msra.mxu1 %v339_v59  ;;  %v461_v11 = vpop.permute.xlu2 %460 }
 0x12b   : > { %1172 = vmatmul.msk.bf16.vlgmr.msra.gmra.mxu0 %vm342_vm7, %v1642_v35  ;;  %1173 = vmatmul.msk.bf16.vlgmr.msra.gmra.mxu1 %vm342_vm7, %v1642_v35 }
 0x12d   : > { %v600_v12 = vpop.permute.xlu1 %599 }
 0x130   : > { %v602_v13 = vpop.permute.xlu2 %601 }
 0x131   : > { %v606_v44 = vsel %vm605_vm14, %v600_v12, %v602_v13 }
 0x138   : > { %v669_v42 = vpop.permute.xlu2 %668 }
 0x139   : > { %v539_v14 = vpop.permute.xlu0 %538  ;;  %v541_v15 = vpop.permute.xlu1 %540 }
 0x13a   : > { %v545_v16 = vsel %vm544_vm12, %v539_v14, %v541_v15  ;;  %v546_v22 = vsel %vm544_vm12, %v541_v15, %v543_v36 }
 0x13b   : > { %559 = vmatpush.bf16.msrb.mxu2 %v545_v16  ;;  %573 = vmatpush.bf16.msrb.mxu3 %v546_v22 }
 0x13e   : > { %1182 = vmatmul.msk.bf16.vlgmr.msrb.gmra.mxu2 %vm342_vm7, %v534_v34  ;;  %1183 = vmatmul.msk.bf16.vlgmr.msrb.gmra.mxu3 %vm342_vm7, %v534_v34 }
 0x13f   : > { %v386_v6 = vpop.f32.mrf.mxu2  ;;  %v400_v30 = vpop.f32.mrf.mxu3 }
 0x140   : > { %v664_v49 = vpop.permute.xlu2 %663 }
 0x141   : > { %v463_v40 = vpop.permute.xlu0 %462  ;;  %v459_v41 = vpop.permute.xlu1 %458 }
 0x142   : > { %v466_v35 = vsel %vm464_vm13, %v461_v11, %v463_v40  ;;  %v465_v43 = vsel %vm464_vm13, %v459_v41, %v461_v11 }
 0x143   : > { %493 = vmatpush.bf16.msrb.mxu1 %v466_v35  ;;  %479 = vmatpush.bf16.msrb.mxu0 %v465_v43  ;;  %v961_v35 = vld [vmem:[%s1844_s3] sm:$0x1] }
 0x144   : > { %963 = vrot.lane.b32.xlu0 %v961_v35, %s1461_s8 }
 0x146   : > { %1181 = vmatmul.msk.bf16.vlgmr.msrb.gmra.mxu1 %vm342_vm7, %v454_v10  ;;  %1180 = vmatmul.msk.bf16.vlgmr.msrb.gmra.mxu0 %vm342_vm7, %v454_v10 }
 0x147   : > { %620 = vmatpush.bf16.msra.mxu0 %v606_v44  ;;  %v388_v58 = vpop.f32.mrf.mxu2  ;;  %v402_v32 = vpop.f32.mrf.mxu3 }
 0x148   : > { %v742_v53 = vpop.permute.xlu2 %741 }
 0x149   : > { %v604_v46 = vpop.permute.xlu0 %603  ;;  %v585_v47 = vpop.permute.xlu1 %584 }
 0x14a   : > { %v607_v48 = vsel %vm605_vm14, %v602_v13, %v604_v46 }
 0x14b   : > { %634 = vmatpush.bf16.msra.mxu1 %v607_v48 }
 0x150   : > { %v788_v2 = vpop.permute.xlu2 %787 }
 0x151   : > { %v738_v51 = vpop.permute.xlu0 %737  ;;  %v673_v52 = vpop.permute.xlu1 %672 }
 0x156   : > { %1197 = vmatmul.msk.bf16.vlgmr.msra.gmra.mxu1 %vm342_vm7, %v585_v47  ;;  %1196 = vmatmul.msk.bf16.vlgmr.msra.gmra.mxu0 %vm342_vm7, %v585_v47 }
 0x158   : > { %v860_v20 = vpop.permute.xlu2 %859 }
 0x159   : > { %v671_v60 = vpop.permute.xlu0 %670  ;;  %v740_v61 = vpop.permute.xlu1 %739 }
 0x15a   : > { %v675_v62 = vsel %vm674_vm15, %v669_v42, %v671_v60  ;;  %v676_v63 = vsel %vm674_vm15, %v671_v60, %v673_v52  ;;  %v744_v0 = vsel %vm743_vm0, %v738_v51, %v740_v61  ;;  %v745_v1 = vsel %vm743_vm0, %v740_v61, %v742_v53 }
 0x15b   : > { %689 = vmatpush.bf16.msra.mxu2 %v675_v62  ;;  %703 = vmatpush.bf16.msra.mxu3 %v676_v63 }
 0x15c   : > { %758 = vmatpush.bf16.msrb.mxu0 %v744_v0  ;;  %772 = vmatpush.bf16.msrb.mxu1 %v745_v1 }
 0x15e   : > { %1198 = vmatmul.msk.bf16.vlgmr.msra.gmra.mxu2 %vm342_vm7, %v664_v49  ;;  %1199 = vmatmul.msk.bf16.vlgmr.msra.gmra.mxu3 %vm342_vm7, %v664_v49 }
 0x160   : > { %v910_v39 = vpop.permute.xlu2 %909 }
 0x161   : > { %v733_v3 = vpop.permute.xlu0 %732  ;;  %v786_v4 = vpop.permute.xlu1 %785 }
 0x162   : > { %v792_v5 = vsel %vm791_vm1, %v786_v4, %v788_v2 }
 0x163   : > { %806 = vmatpush.bf16.msrb.mxu2 %v792_v5 }
 0x166   : > { %1201 = vmatmul.msk.bf16.vlgmr.msrb.gmra.mxu1 %vm342_vm7, %v733_v3  ;;  %1200 = vmatmul.msk.bf16.vlgmr.msrb.gmra.mxu0 %vm342_vm7, %v733_v3 }
 0x169   : > { %v790_v9 = vpop.permute.xlu0 %789  ;;  %v784_v17 = vpop.permute.xlu1 %783 }
 0x16a   : > { %v793_v18 = vsel %vm791_vm1, %v788_v2, %v790_v9 }
 0x16b   : > { %820 = vmatpush.bf16.msrb.mxu3 %v793_v18 }
 0x16e   : > { %1202 = vmatmul.msk.bf16.vlgmr.msrb.gmra.mxu2 %vm342_vm7, %v784_v17  ;;  %1203 = vmatmul.msk.bf16.vlgmr.msrb.gmra.mxu3 %vm342_vm7, %v784_v17 }
 0x171   : > { %v862_v21 = vpop.permute.xlu0 %861  ;;  %v864_v57 = vpop.permute.xlu1 %863 }
 0x172   : > { %v866_v24 = vsel %vm865_vm2, %v860_v20, %v862_v21  ;;  %v867_v25 = vsel %vm865_vm2, %v862_v21, %v864_v57 }
 0x173   : > { %880 = vmatpush.bf16.msra.mxu0 %v866_v24  ;;  %894 = vmatpush.bf16.msra.mxu1 %v867_v25 }
 0x176   : > { %1208 = vmatmul.msk.bf16.vlgmr.msra.gmra.mxu0 %vm342_vm7, %v1207_v26  ;;  %1209 = vmatmul.msk.bf16.vlgmr.msra.gmra.mxu1 %vm342_vm7, %v1207_v26  ;;  %vm951_vm7 = vcmask 39960  }
 0x1a8   : > { %v355_v45 = vpop.f32.mrf.mxu0  ;;  %v369_v27 = vpop.f32.mrf.mxu1 }
 0x1a9   : > { %v387_v15 = vadd.f32 %v386_v6, %v355_v45  ;;  %v401_v16 = vadd.f32 %v400_v30, %v369_v27  ;;  %v927_v45 = vpop.permute.xlu1 %926 }
 0x1b0   : > { %v357_v28 = vpop.f32.mrf.mxu0  ;;  %v371_v29 = vpop.f32.mrf.mxu1 }
 0x1b1   : > { %v389_v46 = vadd.f32 %v388_v58, %v357_v28  ;;  %v403_v47 = vadd.f32 %v402_v32, %v371_v29 }
 0x1c1   : > { %v561_v34 = vpop.f32.mrf.mxu2  ;;  %v575_v36 = vpop.f32.mrf.mxu3 }
 0x1c3   : > { %v495_v31 = vpop.f32.mrf.mxu1  ;;  %v481_v50 = vpop.f32.mrf.mxu0 }
 0x1c4   : > { %v501_v41 = vadd.f32 %v495_v31, %v401_v16  ;;  %v500_v42 = vadd.f32 %v481_v50, %v387_v15 }
 0x1c6   : > { %v581_v43 = vadd.f32 %v575_v36, %v501_v41  ;;  %v580_v44 = vadd.f32 %v561_v34, %v500_v42 }
 0x1c9   : > { %v563_v38 = vpop.f32.mrf.mxu2  ;;  %v577_v59 = vpop.f32.mrf.mxu3 }
 0x1cb   : > { %v497_v10 = vpop.f32.mrf.mxu1  ;;  %v483_v33 = vpop.f32.mrf.mxu0 }
 0x1cc   : > { %v503_v53 = vadd.f32 %v497_v10, %v403_v47  ;;  %v502_v56 = vadd.f32 %v483_v33, %v389_v46  ;;  %v915_v33 = vpop.permute.xlu0 %914 }
 0x1ce   : > { %v583_v0 = vadd.f32 %v577_v59, %v503_v53  ;;  %v582_v1 = vadd.f32 %v563_v38, %v502_v56 }
 0x1d3   : > { %v636_v23 = vpop.f32.mrf.mxu1  ;;  %v622_v37 = vpop.f32.mrf.mxu0 }
 0x1d4   : > { %v642_v51 = vadd.f32 %v636_v23, %v581_v43  ;;  %v641_v52 = vadd.f32 %v622_v37, %v580_v44 }
 0x1db   : > { %v638_v11 = vpop.f32.mrf.mxu1  ;;  %v624_v12 = vpop.f32.mrf.mxu0 }
 0x1dc   : > { %v644_v4 = vadd.f32 %v638_v11, %v583_v0  ;;  %v643_v5 = vadd.f32 %v624_v12, %v582_v1  ;;  %v931_v12 = vpop.permute.xlu2 %930  ;;  %v968_v1 = vld [vmem:[%s1844_s3 + $0x1] sm:$0x1] }
 0x1e1   : > { %v691_v13 = vpop.f32.mrf.mxu2  ;;  %v705_v14 = vpop.f32.mrf.mxu3 }
 0x1e2   : > { %v710_v62 = vadd.f32 %v691_v13, %v641_v52  ;;  %v711_v63 = vadd.f32 %v705_v14, %v642_v51 }
 0x1e3   : > { %v774_v22 = vpop.f32.mrf.mxu1  ;;  %v760_v40 = vpop.f32.mrf.mxu0 }
 0x1e4   : > { %v780_v2 = vadd.f32 %v774_v22, %v711_v63  ;;  %v779_v3 = vadd.f32 %v760_v40, %v710_v62  ;;  %v964_v62 = vpop.permute.xlu0 %963 }
 0x1e9   : > { %v693_v48 = vpop.f32.mrf.mxu2  ;;  %v707_v49 = vpop.f32.mrf.mxu3 }
 0x1ea   : > { %v712_v20 = vadd.f32 %v693_v48, %v643_v5  ;;  %v713_v21 = vadd.f32 %v707_v49, %v644_v4 }
 0x1eb   : > { %v776_v60 = vpop.f32.mrf.mxu1  ;;  %v762_v61 = vpop.f32.mrf.mxu0 }
 0x1ec   : > { %v782_v29 = vadd.f32 %v776_v60, %v713_v21  ;;  %v781_v6 = vadd.f32 %v762_v61, %v712_v20 }
 0x1f1   : > { %v808_v9 = vpop.f32.mrf.mxu2  ;;  %v822_v17 = vpop.f32.mrf.mxu3 }
 0x1f2   : > { %v827_v18 = vadd.f32 %v808_v9, %v779_v3  ;;  %v828_v19 = vadd.f32 %v822_v17, %v780_v2 }
 0x1f3   : > { %v882_v57 = vpop.f32.mrf.mxu0  ;;  %v896_v24 = vpop.f32.mrf.mxu1 }
 0x1f4   : > { %v901_v25 = vadd.f32 %v882_v57, %v827_v18  ;;  %v902_v26 = vadd.f32 %v896_v24, %v828_v19 }
 0x1f6   : > { %v917_v27 = vadd.f32 %v910_v39, %v901_v25  ;;  %v918_v28 = vadd.f32 %v910_v39, %v902_v26 }
 0x1f8   : > { %v933_v30 = vmul.f32 %v927_v45, %v917_v27  ;;  %v934_v31 = vmul.f32 %v927_v45, %v918_v28  ;;  %vm921_vm3 = vcmp.ge.f32.partialorder %v917_v27, 0.0  ;;  %vm922_vm4 = vcmp.ge.f32.partialorder %v918_v28, 0.0 }
 0x1f9   : > { %v810_v50 = vpop.f32.mrf.mxu2  ;;  %v824_v58 = vpop.f32.mrf.mxu3  ;;  %v1464_v45 = vmov 2  }
 0x1fa   : > { %v829_v32 = vadd.f32 %v810_v50, %v781_v6  ;;  %v830_v10 = vadd.f32 %v824_v58, %v782_v29  ;;  %v937_v34 = vsel %vm921_vm3, %v917_v27, %v933_v30  ;;  %v938_v36 = vsel %vm922_vm4, %v918_v28, %v934_v31  ;;  %1330 = vset.pattern.permute.xlu2 %v1464_v45 }
 0x1fb   : > { %v884_v23 = vpop.f32.mrf.mxu0  ;;  %v898_v37 = vpop.f32.mrf.mxu1  ;;  %v941_v38 = vadd.f32 %v938_v36, %v937_v34  ;;  %1329 = vset.pattern.permute.xlu1 %v1464_v45  ;;  %1331 = vset.pattern.permute.xlu0 %v1464_v45 }
 0x1fc   : > { %v903_v59 = vadd.f32 %v884_v23, %v829_v32  ;;  %v904_v11 = vadd.f32 %v898_v37, %v830_v10 }
 0x1fd   : > { %942 = vadd.xlane.f32.xlu1 %v941_v38 }
 0x1fe   : > { %v919_v13 = vadd.f32 %v915_v33, %v903_v59  ;;  %v920_v14 = vadd.f32 %v915_v33, %v904_v11 }
 0x200   : > { %v935_v15 = vmul.f32 %v931_v12, %v919_v13  ;;  %v936_v16 = vmul.f32 %v931_v12, %v920_v14  ;;  %vm923_vm5 = vcmp.ge.f32.partialorder %v919_v13, 0.0  ;;  %vm924_vm6 = vcmp.ge.f32.partialorder %v920_v14, 0.0 }
 0x202   : > { %v939_v22 = vsel %vm923_vm5, %v919_v13, %v935_v15  ;;  %v940_v40 = vsel %vm924_vm6, %v920_v14, %v936_v16 }
 0x203   : > { %v944_v41 = vadd.f32 %v940_v40, %v939_v22 }
 0x205   : > { %945 = vadd.xlane.f32.xlu2 %v944_v41 }
 0x270   : > { %v943_v42 = vpop.xlane.xlu1 %942 }
 0x271   : > { %v947_v35 = vmul.f32 0.00390625, %v943_v42 }
 0x273   : > { %v949_v44 = vmul.f32 %v947_v35, %v1759_v54 }
 0x275   : > { %v952_v48 = vsel %vm951_vm7, %v949_v44, 0.0  ;;  %v1340_v44 = vld [vmem:[%s1588_s25] sm:$0xff] }
 0x278   : > { %v946_v43 = vpop.xlane.xlu2 %945 }
 0x279   : > { %v948_v46 = vmul.f32 0.00390625, %v946_v43 }
 0x27b   : > { %v950_v47 = vmul.f32 %v948_v46, %v1764_v55 }
 0x27d   : > { %v953_v49 = vsel %vm951_vm7, %v950_v47, 0.0 }
 0x27e   : > { %v954_v51 = vadd.f32 %v953_v49, %v952_v48 }
 0x280   : > { %v955_v52 = vrot.slane %v954_v51, 4 }
 0x282   : > { %v956_v53 = vadd.f32 %v955_v52, %v954_v51 }
 0x284   : > { %v957_v56 = vrot.slane %v956_v53, 2 }
 0x286   : > { %v958_v60 = vadd.f32 %v957_v56, %v956_v53 }
 0x288   : > { %v959_v61 = vrot.slane %v958_v60, 1 }
 0x28a   : > { %v960_v63 = vadd.f32 %v959_v61, %v958_v60 }
 0x28c   : > { %v966_v0 = vadd.f32 %v964_v62, %v960_v63 }
 0x28e   : > { %970 = vrot.lane.b32.xlu0 %v966_v0, %s1462_s7  ;;  %vm967_vm9 = vcmp.ge.f32.partialorder %v966_v0, 0.0 }
 0x300   : > { %v971_v2 = vpop.permute.xlu0 %970 }
 0x301   : > { %v973_v3 = vmul.f32 %v971_v2, %v968_v1 }
 0x303   : > { %975 = vrot.lane.b32.xlu0 %v973_v3, %s1461_s8  ;;  %s1386_s8 = sshra.s32 %s1074_s26, 4  ;;  %s1387_s8 = int_to_ptr.hbm [resolvable:$true] %s1386_s8 }
 0x304   : > { %s1388_s22 = scalar_lea.hbm %s1387_s8, 32  ;;  %p1393_p0 = scmp.lt.s32.totalorder %s1387_s8, %s1846_s5 }
 0x305   : > { %p1389_p6 = scmp.ne.s32.totalorder %s1387_s8, %s1388_s22  ;;  %p1394_p1 = scmp.lt.s32.totalorder %s1392_s9, %s1388_s22 }
 0x307   : > { %p1390_p9 = pnand %p1389_p6, %p1546_p11  ;;  %p1395_p3 = por %p1394_p1, %p1393_p0 }
 0x309   : > { %p1391_p13 = pneg %p1390_p9 }
 0x30b   : > { %p1396_p4 = pnand %p1395_p3, %p1391_p13 }
 0x375   : > { %v976_v4 = vpop.permute.xlu0 %975 }
 0x376   : > { %v978_v5 = vsel %vm967_vm9, %v966_v0, %v976_v4 }
 0x377   : > { %v979_v9 = vperm.slane %v978_v5, 0 }
 0x379   : > { %981 = vrot.lane.b32.xlu0 %v979_v9, %s1445_s11  ;;  %s244_s11 = scalar_lea.vmem [#allocation6], %s1154_s14  ;;  %s1059_s14 = scalar_lea.sflag [#allocation5], %s1582_s12 }
 0x37a   : > { %s1071_s17 = sshll.u32 %s244_s11, 4  ;;  %s1072_s17 = int_to_ptr.vmem [resolvable:$true] %s1071_s17 }
 0x3eb   : > { %v982_v17 = vpop.permute.xlu0 %981 }
 0x3ec   : > { %v984_v18 = vmul.f32 %v982_v17, %v1759_v54  ;;  %v985_v19 = vmul.f32 %v982_v17, %v1764_v55 }
 0x3ee   : > { %990 = vrot.lane.b32.xlu2 %v985_v19, %s1463_s10  ;;  %988 = vrot.lane.b32.xlu0 %v984_v18, %s1463_s10 }
 0x448   : > { %v991_v39 = vpop.permute.xlu2 %990 }
 0x449   : > { %v997_v20 = vsel %vm432_vm8, %v991_v39, 0.0 }
 0x44a   : > { %998 = vadd.xlane.f32.xlu0 %v997_v20 }
 0x460   : > { %v989_v21 = vpop.permute.xlu0 %988 }
 0x461   : > { %v994_v57 = vsel %vm432_vm8, %v989_v21, 0.0 }
 0x462   : > { %995 = vadd.xlane.f32.xlu1 %v994_v57 }
 0x4bd   : > { %v999_v24 = vpop.xlane.xlu0 %998 }
 0x4be   : > { %v1001_v25 = vadd.f32 %v999_v24, %v1764_v55 }
 0x4c0   : > { %v1211_v26 = vmul.f32 -1.442695, %v1001_v25 }
 0x4c2   : > { %1332 = vpow2.f32 %v1211_v26 }
 0x4c8   : > { %v1333_v27 = vpop.eup %1332 }
 0x4c9   : > { %v1009_v28 = vadd.f32 1.0, %v1333_v27 }
 0x4cb   : > { %1334 = vrcp.f32 %v1009_v28  ;;  %v1036_v50 = vand.u32 2147483648, %v1009_v28  ;;  %v1034_v10 = vand.u32 2147483647, %v1009_v28  ;;  %vm1030_vm10 = vweird.f32 %v1009_v28 }
 0x4cd   : > { %v1037_v34 = vor.u32 1.1754944e-38, %v1036_v50  ;;  %vm1035_vm12 = vcmp.eq.f32.partialorder %v1034_v10, 8.507059e+37 }
 0x4d1   : > { %v1335_v29 = vpop.eup %1334 }
 0x4d2   : > { %v1026_v6 = vmul.f32 %v1335_v29, %v1009_v28  ;;  %vm1031_vm8 = vweird.f32 %v1335_v29 }
 0x4d3   : > { %vm1032_vm11 = vmor %vm1030_vm10, %vm1031_vm8 }
 0x4d4   : > { %v1027_v30 = vsub.f32 1.0, %v1026_v6 }
 0x4d5   : > { %v996_v31 = vpop.xlane.xlu1 %995 }
 0x4d6   : > { %v1000_v58 = vadd.f32 %v996_v31, %v1759_v54  ;;  %v1028_v32 = vmul.f32 %v1335_v29, %v1027_v30 }
 0x4d8   : > { %v1210_v55 = vmul.f32 -1.442695, %v1000_v58  ;;  %v1029_v33 = vadd.f32 %v1335_v29, %v1028_v32 }
 0x4da   : > { %1336 = vpow2.f32 %v1210_v55  ;;  %v1033_v36 = vsel %vm1032_vm11, %v1335_v29, %v1029_v33 }
 0x4db   : > { %v1038_v23 = vsel %vm1035_vm12, %v1037_v34, %v1033_v36 }
 0x4dc   : > { %1047 = vperm.xlu2 %1330, %v1038_v23  }
 0x4e0   : > { %v1337_v37 = vpop.eup %1336 }
 0x4e1   : > { %v1008_v38 = vadd.f32 1.0, %v1337_v37 }
 0x4e3   : > { %1338 = vrcp.f32 %v1008_v38  ;;  %v1021_v54 = vand.u32 2147483648, %v1008_v38  ;;  %v1019_v14 = vand.u32 2147483647, %v1008_v38  ;;  %vm1015_vm14 = vweird.f32 %v1008_v38 }
 0x4e5   : > { %v1022_v16 = vor.u32 1.1754944e-38, %v1021_v54  ;;  %vm1020_vm0 = vcmp.eq.f32.partialorder %v1019_v14, 8.507059e+37 }
 0x4e9   : > { %v1339_v59 = vpop.eup %1338 }
 0x4ea   : > { %v1011_v11 = vmul.f32 %v1339_v59, %v1008_v38  ;;  %vm1016_vm13 = vweird.f32 %v1339_v59 }
 0x4eb   : > { %vm1017_vm15 = vmor %vm1015_vm14, %vm1016_vm13 }
 0x4ec   : > { %v1012_v12 = vsub.f32 1.0, %v1011_v11 }
 0x4ee   : > { %v1013_v13 = vmul.f32 %v1339_v59, %v1012_v12 }
 0x4f0   : > { %v1014_v15 = vadd.f32 %v1339_v59, %v1013_v13 }
 0x4f2   : > { %v1018_v22 = vsel %vm1017_vm15, %v1339_v59, %v1014_v15 }
 0x4f3   : > { %v1023_v40 = vsel %vm1020_vm0, %v1022_v16, %v1018_v22 }
 0x4f4   : > { %1042 = vperm.xlu1 %1329, %v1023_v40  }
 0x536   : > { %v1048_v41 = vpop.permute.xlu2 %1047 }
 0x537   : > { %v1052_v42 = vmul.f32 %v1048_v41, %v1608_v7  ;;  %v1053_v35 = vmul.f32 %v1048_v41, %v1611_v8  ;;  %v1341_v7 = vld [vmem:[%s1588_s25 + $0x8] sm:$0xff] }
 0x539   : > { %1056 = vst [vmem:[%s244_s11 + $0x10] sm:$0xff] %v1052_v42 }
 0x53a   : > { %1057 = vst [vmem:[%s244_s11 + $0x18] sm:$0xff] %v1053_v35 }
 0x566   : > { %v1043_v43 = vpop.permute.xlu1 %1042 }
 0x567   : > { %v1050_v46 = vmul.f32 %v1340_v44, %v1043_v43  ;;  %v1051_v47 = vmul.f32 %v1341_v7, %v1043_v43 }
 0x569   : > { %1054 = vst [vmem:[%s244_s11] sm:$0xff] %v1050_v46 }
 0x56a   : > { %1055 = vst [vmem:[%s244_s11 + $0x8] sm:$0xff] %v1051_v47 }
 0x56b   : > { %1399 = shalt.err (!%p1396_p4)
}
 0x56c   : > { %s1465_s12 = smov 256  }
 0x56d   : > { %1230 = dma.vmem_to_hbm [thread:$0]  (%p1546_p11), %s1072_s17, 512, %s1074_s26, %s1059_s14, %s1465_s12, %s1465_s12, %s1447_s13  }
 0x56e PF: > { %s1088_s25 = sand.u32 1, %s1426_s18   ;;  %p1852_p7 = scmp.ge.s32.totalorder %s1438_s21, 2 }
 0x56f   : > { %s1089_s11 = scalar_lea.sflag [#allocation5], %s1088_s25 }
 0x570   : > { %p1237_p5 = pnand %p1852_p7, %p1550_p12 }
 0x572   : > { %p1238_p8 = pneg %p1237_p5 }
 0x574   : > { %1421 = dma.done.wait (%p1238_p8), %s1089_s11, 512  }
 0x575   : > { %1423 = vsyncadd (%p1238_p8), %s1089_s11, 4294966784  ;;  %p18_p10 = scmp.ge.s32.totalorder %s1521_s24, 4   ;;  %s1853_s18 = smov %s1430_s19 }
 0x576   : > { %s1854_s19 = smov %s1434_s20  ;;  %s1855_s20 = smov %s1533_s27 }
 0x577   : > { %s1856_s21 = smov %s1521_s24  ;;  %20 = sbr.rel (!%p18_p10) target bundleno = 5 (0x5), region = 85 }
 0x57c   :  { %1095 = vsyncpa [#allocation4], 1 }
 0x57d   :  { %1097 = vsyncpa [#allocation4 + $0x1], 1 }
 0x57e   :  { %1098 = vsyncpa [#allocation5], 1 }
 0x57f   :  { %1100 = vsyncpa [#allocation5 + $0x1], 1 }

</bundles_post_ra>
